<compile_context>
chip_gen: v7x
topology: tpu7x:2x2x1
jax: 0.10.0
libtpu: 0.0.40
codegen_flags: <defaults>
</compile_context>

<pallas_src>
import functools

import jax
import jax.numpy as jnp
from jax.experimental import pallas as pl
from jax.experimental.pallas import tpu as pltpu


def _round_up(x: int, m: int) -> int:
    return ((x + m - 1) // m) * m


# Conservative per-step working-set budget (double-buffered blocks + scratch).
# Fits comfortably inside v5e/v6e VMEM and v7x's 64 MiB physical VMEM.
_VMEM_FOOTPRINT_BUDGET = 32 * 1024 * 1024
# Explicit scoped-VMEM limit (below v7x physical, above every footprint we allow).
_VMEM_LIMIT_BYTES = 48 * 1024 * 1024


def _footprint_bytes(tm, tn, tk, x_bytes, w_bytes, out_bytes, needs_acc):
    xb = 2 * tm * tk * x_bytes        # double-buffered activation block
    wb = 2 * tk * tn * w_bytes        # double-buffered weight block
    bb = 2 * 1 * tn * 4               # double-buffered bias block (f32)
    ob = 2 * tm * tn * out_bytes      # double-buffered output block
    ab = tm * tn * 4 if needs_acc else 0
    return xb + wb + bb + ob + ab


# -----------------------------------------------------------------------------
# Kernels
# -----------------------------------------------------------------------------
def _relu_linear_fused_kernel(x_ref, w_ref, b_ref, o_ref):
    """Single-K-tile path: no accumulator scratch, no pl.when gates."""
    x = jnp.maximum(x_ref[...], 0.0).astype(w_ref.dtype)
    o_ref[...] = (
        b_ref[...] + jnp.dot(x, w_ref[...], preferred_element_type=jnp.float32)
    ).astype(o_ref.dtype)


def _relu_linear_acc_kernel(x_ref, w_ref, b_ref, o_ref, acc_ref):
    """Fallback for large K: f32 VMEM accumulator, reduction axis last."""
    k = pl.program_id(2)

    @pl.when(k == 0)
    def _init():
        acc_ref[...] = jnp.broadcast_to(b_ref[...], acc_ref.shape)

    x = jnp.maximum(x_ref[...], 0.0).astype(w_ref.dtype)
    acc_ref[...] += jnp.dot(x, w_ref[...], preferred_element_type=jnp.float32)

    @pl.when(k == pl.num_programs(2) - 1)
    def _store():
        o_ref[...] = acc_ref[...].astype(o_ref.dtype)


# -----------------------------------------------------------------------------
# One-time parameter preparation (hoisted out of the per-call path)
# -----------------------------------------------------------------------------
def prepare_linear_params(weight, bias, *, compute_dtype=jnp.float32):
    """weight: (out, in) PyTorch layout; bias: (out,).

    Returns (w_t_padded, b_padded) with
      w_t_padded: (Kp, Np) in `compute_dtype`, Kp/Np padded to multiples of 128
      b_padded:   (1, Np) float32
    bf16 weights are fine on ALL generations (v5e's MXU is bf16-native); only
    accumulation precision matters and it stays f32 in-kernel.
    Do this ONCE per model, not per forward call.
    """
    out_neurons, d = weight.shape
    kp = _round_up(d, 128)
    np_ = _round_up(out_neurons, 128)
    w_t = jnp.transpose(weight)                                   # (D, out)
    w_t = jnp.pad(w_t, ((0, kp - d), (0, np_ - out_neurons)))
    w_t = w_t.astype(compute_dtype)
    b2d = jnp.pad(bias, (0, np_ - out_neurons)).reshape(1, np_).astype(jnp.float32)
    return w_t, b2d


# -----------------------------------------------------------------------------
# Forward
# -----------------------------------------------------------------------------
@functools.partial(jax.jit, static_argnames=("out_neurons",))
def linear_classifier_forward(x, w_prepared, b_prepared, out_neurons):
    """x: [B, D] (f32 or bf16); w_prepared/b_prepared from prepare_linear_params().

    Activation dtype follows x.dtype — pass bf16 x on v6e/v7x (or v5e) to halve
    the activation DMA stream; ReLU is computed in that dtype in-kernel and the
    matmul accumulates in f32.
    """
    B, D = x.shape
    Kp, Np = w_prepared.shape
    x_bytes = jnp.dtype(x.dtype).itemsize
    w_bytes = jnp.dtype(w_prepared.dtype).itemsize
    out_bytes = x_bytes

    # ---- batch (M) tile: largest of (512, 256, 128) that adds no extra padding.
    if B <= 128:
        tm = _round_up(B, 8)
        Bp = tm
    else:
        bp_min = _round_up(B, 128)
        tm = 128
        for c in (512, 256):
            if _round_up(B, c) == bp_min:
                tm = c
                break
        Bp = _round_up(B, tm)

    # ---- K / N tiles: prefer collapsing K entirely, then full N, shrink only
    # ---- when the double-buffered footprint exceeds the VMEM budget.
    tk_cands = [Kp] + [c for c in (1024, 512, 256, 128) if c < Kp and Kp % c == 0]
    tn_cands = [Np] + [c for c in (1024, 512, 256, 128) if c < Np and Np % c == 0]
    tk, tn = 128, 128
    found = False
    for tk_c in tk_cands:
        for tn_c in tn_cands:
            fp = _footprint_bytes(tm, tn_c, tk_c, x_bytes, w_bytes, out_bytes,
                                  needs_acc=(tk_c < Kp))
            if fp <= _VMEM_FOOTPRINT_BUDGET:
                tk, tn, found = tk_c, tn_c, True
                break
        if found:
            break

    m_steps, n_steps, k_steps = Bp // tm, Np // tn, Kp // tk

    # Megacore (v7x): make sure there are >= 2 parallel blocks when there is
    # real work; harmless elsewhere.
    if (m_steps == 1 and n_steps == 1 and k_steps == 1
            and Bp >= 128 and Np % 256 == 0):
        tn = Np // 2
        n_steps = 2

    # Zero padding is ReLU/matmul-neutral.
    x_p = jnp.pad(x, ((0, Bp - B), (0, Kp - D)))

    flops = 2 * Bp * Kp * Np

    if k_steps == 1:
        # x block index is constant in j -> fetched once per i; weights/bias
        # re-fetched once per i.
        bytes_accessed = (Bp * Kp * x_bytes
                          + Kp * Np * w_bytes * m_steps
                          + Np * 4 * m_steps
                          + Bp * Np * out_bytes)
        out_padded = pl.pallas_call(
            _relu_linear_fused_kernel,
            out_shape=jax.ShapeDtypeStruct((Bp, Np), x.dtype),
            grid=(m_steps, n_steps),
            in_specs=[
                pl.BlockSpec((tm, Kp), lambda i, j: (i, 0)),      # x (full K)
                pl.BlockSpec((Kp, tn), lambda i, j: (0, j)),      # weight (K, N)
                pl.BlockSpec((1, tn), lambda i, j: (0, j)),       # bias
            ],
            out_specs=pl.BlockSpec((tm, tn), lambda i, j: (i, j)),
            compiler_params=pltpu.CompilerParams(
                dimension_semantics=("parallel", "parallel"),
                vmem_limit_bytes=_VMEM_LIMIT_BYTES),
            cost_estimate=pl.CostEstimate(
                flops=flops, transcendentals=0, bytes_accessed=bytes_accessed),
        )(x_p, w_prepared, b_prepared)
    else:
        # x re-read once per N revisit; weights/bias once per M revisit.
        bytes_accessed = (Bp * Kp * x_bytes * n_steps
                          + Kp * Np * w_bytes * m_steps
                          + Np * 4 * m_steps
                          + Bp * Np * out_bytes)
        out_padded = pl.pallas_call(
            _relu_linear_acc_kernel,
            out_shape=jax.ShapeDtypeStruct((Bp, Np), x.dtype),
            grid=(m_steps, n_steps, k_steps),
            in_specs=[
                pl.BlockSpec((tm, tk), lambda i, j, k: (i, k)),   # x
                pl.BlockSpec((tk, tn), lambda i, j, k: (k, j)),   # weight (K, N)
                pl.BlockSpec((1, tn), lambda i, j, k: (0, j)),    # bias
            ],
            out_specs=pl.BlockSpec((tm, tn), lambda i, j, k: (i, j)),
            scratch_shapes=[pltpu.VMEM((tm, tn), jnp.float32)],
            compiler_params=pltpu.CompilerParams(
                dimension_semantics=("parallel", "parallel", "arbitrary"),
                vmem_limit_bytes=_VMEM_LIMIT_BYTES),
            cost_estimate=pl.CostEstimate(
                flops=flops, transcendentals=0, bytes_accessed=bytes_accessed),
        )(x_p, w_prepared, b_prepared)

    return out_padded[:B, :out_neurons]


def make_params(key, input_dim, out_neurons):
    """Deterministic synthetic parameters matching nn.Linear(input_dim, out_neurons)."""
    kw, kb = jax.random.split(key)
    bound = 1.0 / jnp.sqrt(jnp.float32(input_dim))
    weight = jax.random.uniform(kw, (out_neurons, input_dim),
                                minval=-bound, maxval=bound, dtype=jnp.float32)
    bias = jax.random.uniform(kb, (out_neurons,),
                              minval=-bound, maxval=bound, dtype=jnp.float32)
    return weight, bias


# TODO(synk): DenseLayer blocks are not included since default num_blocks=0 and
# DenseLayer's definition is not part of the provided module.

if __name__ == "__main__":
    key = jax.random.PRNGKey(0)
    kx, kp = jax.random.split(key)

    B, input_dim, out_neurons = 4, 32, 64   # small shapes
    x = jax.random.normal(kx, (B, input_dim), dtype=jnp.float32)
    weight, bias = make_params(kp, input_dim, out_neurons)

    # Reference in plain JAX (same math as the PyTorch forward).
    ref = jnp.maximum(x, 0.0) @ weight.T + bias

    # ---- f32 weights + f32 activations (exact path) ----
    w_f32, b_f32 = prepare_linear_params(weight, bias, compute_dtype=jnp.float32)
    out_f32 = jax.block_until_ready(
        linear_classifier_forward(x, w_f32, b_f32, out_neurons))
    assert out_f32.shape == (B, out_neurons)
    assert jnp.allclose(out_f32, ref, atol=1e-5, rtol=1e-5)

    # ---- bf16 weights + bf16 activations (halved HBM streams, all gens) ----
    w_bf16, b_bf16 = prepare_linear_params(weight, bias, compute_dtype=jnp.bfloat16)
    out_bf16 = jax.block_until_ready(
        linear_classifier_forward(x.astype(jnp.bfloat16), w_bf16, b_bf16, out_neurons))
    assert out_bf16.shape == (B, out_neurons)
    # Tolerance reflects bf16 rounding of BOTH activations and weights; f32 accumulation.
    assert jnp.allclose(out_bf16.astype(jnp.float32), ref, atol=3e-2, rtol=3e-2)

    print("KERNEL_OK")
</pallas_src>

<mosaic_0001>
module attributes {stable_mosaic.version = 11 : i64} {
  func.func @_relu_linear_fused_kernel(%arg0: i32, %arg1: i32, %arg2: memref<8x128xf32, #tpu.memory_space<vmem>>, %arg3: memref<128x128xf32, #tpu.memory_space<vmem>>, %arg4: memref<1x128xf32, #tpu.memory_space<vmem>>, %arg5: memref<8x128xf32, #tpu.memory_space<vmem>>) attributes {dimension_semantics = [#tpu.dimension_semantics<parallel>, #tpu.dimension_semantics<parallel>], iteration_bounds = array<i64: 1, 1>, scalar_prefetch = 0 : i64, scratch_operands = 0 : i64, tpu.core_type = #tpu.core_type<tc>, window_params = [{transform_indices = @transform_0, window_bounds = array<i64: 8, 128>}, {transform_indices = @transform_1, window_bounds = array<i64: 128, 128>}, {transform_indices = @transform_2, window_bounds = array<i64: 1, 128>}, {transform_indices = @transform_3, window_bounds = array<i64: 8, 128>}]} {
    %c0 = arith.constant 0 : index
    %c0_0 = arith.constant 0 : index
    %0 = vector.load %arg2[%c0, %c0_0] : memref<8x128xf32, #tpu.memory_space<vmem>>, vector<8x128xf32>
    %cst = arith.constant 0.000000e+00 : f32
    %1 = vector.broadcast %cst : f32 to vector<8x128xf32>
    %2 = arith.maximumf %0, %1 : vector<8x128xf32>
    %c0_1 = arith.constant 0 : index
    %c0_2 = arith.constant 0 : index
    %3 = vector.load %arg4[%c0_1, %c0_2] : memref<1x128xf32, #tpu.memory_space<vmem>>, vector<1x128xf32>
    %c0_3 = arith.constant 0 : index
    %c0_4 = arith.constant 0 : index
    %4 = vector.load %arg3[%c0_3, %c0_4] : memref<128x128xf32, #tpu.memory_space<vmem>>, vector<128x128xf32>
    %cst_5 = arith.constant dense<0.000000e+00> : vector<8x128xf32>
    %5 = tpu.matmul %2, %4, %cst_5 {dimension_numbers = #tpu.dot_dimension_numbers<[1], [0], [0], [1], [0, 0, 1, 1], [], []>} : vector<8x128xf32>, vector<128x128xf32>, vector<8x128xf32> -> vector<8x128xf32>
    %6 = vector.broadcast %3 : vector<1x128xf32> to vector<8x128xf32>
    %7 = arith.addf %6, %5 : vector<8x128xf32>
    %c0_6 = arith.constant 0 : index
    %c0_7 = arith.constant 0 : index
    %8 = vector.load %arg5[%c0_6, %c0_7] : memref<8x128xf32, #tpu.memory_space<vmem>>, vector<8x128xf32>
    tpu.vector_store %arg5[%c0_6, %c0_7], %7 {strides = array<i32>} : memref<8x128xf32, #tpu.memory_space<vmem>>, vector<8x128xf32>,
    return
  }
  func.func @transform_0(%arg0: i32, %arg1: i32) -> (i32, i32) {
    %c0_i32 = arith.constant 0 : i32
    %c0_i32_0 = arith.constant 0 : i32
    return %arg0, %c0_i32 : i32, i32
  }
  func.func @transform_1(%arg0: i32, %arg1: i32) -> (i32, i32) {
    %c0_i32 = arith.constant 0 : i32
    %c0_i32_0 = arith.constant 0 : i32
    return %c0_i32, %arg1 : i32, i32
  }
  func.func @transform_2(%arg0: i32, %arg1: i32) -> (i32, i32) {
    %c0_i32 = arith.constant 0 : i32
    %c0_i32_0 = arith.constant 0 : i32
    return %c0_i32, %arg1 : i32, i32
  }
  func.func @transform_3(%arg0: i32, %arg1: i32) -> (i32, i32) {
    %c0_i32 = arith.constant 0 : i32
    return %arg0, %arg1 : i32, i32
  }
}

</mosaic_0001>

<bundles_post_ra>
// kernel: linear_classifier_forward.1
= control target key start
LH: loop header
LB: loop body
LE: loop exit
PB: predicated region body
PF: predicated region fallthrough
CT: control target
= control target key end

     0   :  { %8 = vsyncpa [#allocation3], 0  ;;  %s237_s12 = smov [#allocation2]   ;;  %s284_s0 = inlined_call_operand.vmem [shape: f32[8,128], index: 0, kind: input, shape index: {}]   ;;  %s285_s1 = inlined_call_operand.hbm [shape: f32[128,128], index: 1, kind: input, shape index: {}]   ;;  %s286_s2 = inlined_call_operand.vmem [shape: f32[1,128], index: 2, kind: input, shape index: {}]   ;;  %s287_s3 = inlined_call_operand.vmem [shape: f32[8,128], index: 3, kind: output, shape index: {}]  }
   0x1   :  { %s16_s13 = sshll.u32 %s237_s12, 4  ;;  %s213_s16 = scalar_lea.hbm %s285_s1, 2048  ;;  %s17_s13 = int_to_ptr.vmem [resolvable:$true] %s16_s13 }
   0x2   :  { %p214_p0 = scmp.ne.s32.totalorder %s285_s1, %s213_s16  ;;  %p217_p1 = scmp.lt.u32.totalorder %s213_s16, %s285_s1 }
   0x4   :  { %p219_p2 = pnand %p217_p1, %p214_p0 }
   0x6   :  { %222 = shalt.err (!%p219_p2)
}
   0x7   :  { %s223_s21 = scalar_lea.vmem %s17_s13, 2048  ;;  %p228_p4 = scmp.lt.s32.totalorder %s17_s13, %s17_s13 }
   0x8   :  { %p224_p3 = scmp.ne.s32.totalorder %s17_s13, %s223_s21  ;;  %p229_p5 = scmp.lt.s32.totalorder %s223_s21, %s223_s21 }
   0xa   :  { %p230_p6 = por %p229_p5, %p228_p4 }
   0xc   :  { %p231_p7 = pnand %p230_p6, %p224_p3 }
   0xe   :  { %234 = shalt.err (!%p231_p7)
}
   0xf   :  { %s238_s22 = smov 128   ;;  %s239_s23 = smov 8  }
  0x10   :  { %22 = dma.hbm_to_vmem [thread:$0]  %s285_s1, 2048, %s17_s13, [#allocation3], %s238_s22, %s238_s22, %s239_s23  }
  0x11   :  { %235 = dma.done.wait [#allocation3], 2048  }
  0x12   :  { %236 = vsyncadd [#allocation3], 4294965248  ;;  %v240_v0 = vmov 0.0|0.0   ;;  %vm241_vm0 = vmmov 0   ;;  %v242_v1 = vmov 0.0   ;;  %v31_v2 = vld [vmem:[#allocation2] sm:$0xff] }
  0x13   :  { %183 = vmatprep.subr.bf16.mxu0 %v240_v0  ;;  %180 = vmatprep.mubr.msk.f32.mxu0 %vm241_vm0, %v242_v1  ;;  %v32_v3 = vld [vmem:[#allocation2 + $0x8] sm:$0xff]  ;;  %v33_v4 = vld [vmem:[#allocation2 + $0x10] sm:$0xff]  ;;  %v34_v6 = vld [vmem:[#allocation2 + $0x18] sm:$0xff] }
  0x14   :  { %v184_v5 = vpack.c.bf16 %v32_v3, %v31_v2  ;;  %v187_v7 = vpack.c.bf16 %v34_v6, %v33_v4  ;;  %v35_v8 = vld [vmem:[#allocation2 + $0x20] sm:$0xff]  ;;  %v36_v9 = vld [vmem:[#allocation2 + $0x28] sm:$0xff]  ;;  %v37_v11 = vld [vmem:[#allocation2 + $0x30] sm:$0xff] }
  0x15   :  { %v190_v10 = vpack.c.bf16 %v36_v9, %v35_v8  ;;  %v38_v12 = vld [vmem:[#allocation2 + $0x38] sm:$0xff]  ;;  %v39_v14 = vld [vmem:[#allocation2 + $0x40] sm:$0xff]  ;;  %v40_v15 = vld [vmem:[#allocation2 + $0x48] sm:$0xff] }
  0x16   :  { %185 = vmatpush3.bf16.msra.mxu0 %v184_v5  ;;  %v193_v13 = vpack.c.bf16 %v38_v12, %v37_v11  ;;  %v196_v16 = vpack.c.bf16 %v40_v15, %v39_v14  ;;  %v41_v17 = vld [vmem:[#allocation2 + $0x50] sm:$0xff]  ;;  %v42_v18 = vld [vmem:[#allocation2 + $0x58] sm:$0xff]  ;;  %v43_v20 = vld [vmem:[#allocation2 + $0x60] sm:$0xff] }
  0x17   :  { %186 = vmatprep.subr.bf16.mxu0 %v240_v0  ;;  %v199_v19 = vpack.c.bf16 %v42_v18, %v41_v17  ;;  %v44_v21 = vld [vmem:[#allocation2 + $0x68] sm:$0xff]  ;;  %v45_v23 = vld [vmem:[#allocation2 + $0x70] sm:$0xff]  ;;  %v46_v24 = vld [vmem:[#allocation2 + $0x78] sm:$0xff] }
  0x18   :  { %v202_v22 = vpack.c.bf16 %v44_v21, %v43_v20  ;;  %v205_v25 = vpack.c.bf16 %v46_v24, %v45_v23  ;;  %v28_v26 = vld [vmem:[%s284_s0] sm:$0xff] }
  0x19   :  { %v29_v27 = vmax.f32 %v28_v26, 0.0  ;;  %v130_v28 = vld [vmem:[%s286_s2] ss:$0 sm:$0xff] }
  0x1a   :  { %188 = vmatpush3.bf16.msra.mxu0 %v187_v7 }
  0x1b   :  { %189 = vmatprep.subr.bf16.mxu0 %v240_v0 }
  0x1e   :  { %191 = vmatpush3.bf16.msra.mxu0 %v190_v10 }
  0x1f   :  { %192 = vmatprep.subr.bf16.mxu0 %v240_v0 }
  0x22   :  { %194 = vmatpush3.bf16.msra.mxu0 %v193_v13 }
  0x23   :  { %195 = vmatprep.subr.bf16.mxu0 %v240_v0 }
  0x26   :  { %197 = vmatpush3.bf16.msra.mxu0 %v196_v16 }
  0x27   :  { %198 = vmatprep.subr.bf16.mxu0 %v240_v0 }
  0x2a   :  { %200 = vmatpush3.bf16.msra.mxu0 %v199_v19 }
  0x2b   :  { %201 = vmatprep.subr.bf16.mxu0 %v240_v0 }
  0x2e   :  { %203 = vmatpush3.bf16.msra.mxu0 %v202_v22 }
  0x2f   :  { %204 = vmatprep.subr.bf16.mxu0 %v240_v0 }
  0x32   :  { %206 = vmatpush3.bf16.msra.mxu0 %v205_v25 }
  0x35   :  { %181 = vmatmul.mubr.f32.vlgmr.msra.gmra.mrb[0].mxu0 %v29_v27 }
 0x108   :  { %v113_v29 = vpop.f32.mrb[0].mxu0 }
 0x109   :  { %v123_v30 = vadd.f32 %v130_v28, %v113_v29  ;;  %v182_v31 = vpop.f32.mrb[1].mxu0 }
 0x10b   :  { %124 = vst [vmem:[%s287_s3] sm:$0xff] %v123_v30 }
 0x10c   :  { %129 = vsyncpa [#allocation3], 1 }

</bundles_post_ra>
